<compile_context>
chip_gen: v5e
topology: v5e:2x2
jax: 0.10.0
libtpu: 0.0.40
codegen_flags: <defaults>
</compile_context>

<pallas_src>
import functools

import jax
import jax.numpy as jnp
from jax import lax
from jax.experimental import pallas as pl
from jax.experimental.pallas import tpu as pltpu

# ----------------- cfg.TRAIN.* constants (baked into the kernel) -----------------
TWIN_NORMALIZE_MEANS = (0.0, 0.0)
TWIN_NORMALIZE_STDS = (0.1, 0.2)
TWIN_INSIDE_WEIGHTS = (1.0, 1.0)
TWIN_NORMALIZE_TARGETS_PRECOMPUTED = True
TRAIN_BATCH_SIZE = 8          # rois_per_video (num_videos == 1)
FG_FRACTION = 0.25
FG_THRESH = 0.5
BG_THRESH_HI = 0.5
BG_THRESH_LO = 0.0
NUM_CLASSES = 4

_INV_STDS = tuple(1.0 / s for s in TWIN_NORMALIZE_STDS)
_NEG = -1e30


# ============================ fused Pallas kernel (per batch) ============================
def _ptl_kernel(roi_ref, gt_ref,
                rois_ref, lab_ref, tt_ref, tiw_ref, tow_ref,
                *, fg_per, rois_per):
    f32 = jnp.float32
    roi = roi_ref[0]        # (2, N)  row0=start, row1=end    (N on lanes)
    gt = gt_ref[0]          # (3, K)  row0=start, row1=end, row2=class label
    N = roi.shape[1]
    K = gt.shape[1]
    R = rois_ref.shape[2]

    rs = roi[0:1, :]        # (1, N)
    re = roi[1:2, :]
    a_len = re - rs + 1.0

    # ---- 1-D IoU overlaps + fused running max/argmax + assigned-gt gather over K ----
    max_ov = jnp.full((1, N), _NEG, f32)
    best_lab = jnp.zeros((1, N), f32)
    best_gs = jnp.zeros((1, N), f32)
    best_ge = jnp.zeros((1, N), f32)
    for k in range(K):                           # K small & static -> unrolled VPU ops
        gs_k = gt[0:1, k:k + 1]                  # (1,1)
        ge_k = gt[1:2, k:k + 1]
        gl_k = gt[2:3, k:k + 1]
        g_len = ge_k - gs_k + 1.0
        ilen = jnp.minimum(re, ge_k) - jnp.maximum(rs, gs_k) + 1.0
        ilen = jnp.maximum(ilen, 0.0)
        ov = ilen / (a_len + g_len - ilen)
        ov = jnp.where(g_len == 1.0, 0.0, ov)    # zero-size (padding) gt -> overlap 0
        ov = jnp.where(a_len == 1.0, -1.0, ov)   # zero-size roi          -> overlap -1
        better = ov > max_ov                     # strict > keeps first-index argmax
        max_ov = jnp.where(better, ov, max_ov)
        best_lab = jnp.where(better, gl_k, best_lab)
        best_gs = jnp.where(better, gs_k, best_gs)
        best_ge = jnp.where(better, ge_k, best_ge)

    # ---- fg/bg masks, counts and stable in-order ranks (prefix sum via tiny matmul) ----
    fg_f = (max_ov >= FG_THRESH).astype(f32)                               # (1,N)
    bg_f = ((max_ov < BG_THRESH_HI) & (max_ov >= BG_THRESH_LO)).astype(f32)
    fg_num = jnp.sum(fg_f, axis=1, keepdims=True)                          # (1,1)
    bg_num = jnp.sum(bg_f, axis=1, keepdims=True)

    src = lax.broadcasted_iota(jnp.int32, (N, N), 0)
    dst = lax.broadcasted_iota(jnp.int32, (N, N), 1)
    tri = (src <= dst).astype(f32)                                          # (N,N)
    masks = jnp.concatenate([fg_f, bg_f], axis=0)                           # (2,N)
    ranks = jnp.dot(masks, tri, preferred_element_type=f32) - 1.0           # (2,N)
    rank_fg = ranks[0:1, :]
    rank_bg = ranks[1:2, :]

    has_fg = fg_num > 0.0
    has_bg = bg_num > 0.0
    fg_this = jnp.where(has_bg, jnp.minimum(fg_per, fg_num), rois_per)
    fg_this = jnp.where(has_fg, fg_this, 0.0)                               # (1,1)

    # ---- (R,N) selection matrix: slot j -> (j mod fg_num)-th fg, else cycled bg ----
    slot = lax.broadcasted_iota(jnp.int32, (R, 1), 0).astype(f32)           # (R,1)
    fgn = jnp.maximum(fg_num, 1.0)
    bgn = jnp.maximum(bg_num, 1.0)
    m_fg = slot - fgn * jnp.floor(slot / fgn)                               # j mod fg_num
    off = jnp.maximum(slot - fg_this, 0.0)
    m_bg = off - bgn * jnp.floor(off / bgn)                                 # (j-fg) mod bg_num
    want_fg = slot < fg_this
    match = jnp.where(want_fg,
                      jnp.where(rank_fg == m_fg, fg_f, 0.0),
                      jnp.where(rank_bg == m_bg, bg_f, 0.0))                # (R,N)

    # ---- gather roi / label / assigned-gt for the R slots with one NT contraction ----
    vals = jnp.concatenate([rs, re, best_lab, best_gs, best_ge], axis=0)    # (5,N)
    picked = lax.dot_general(vals, match,
                             dimension_numbers=(((1,), (1,)), ((), ())),
                             preferred_element_type=f32)                    # (5,R)
    sel_rs = picked[0:1, :]
    sel_re = picked[1:2, :]
    sel_lab = picked[2:3, :]
    sel_gs = picked[3:4, :]
    sel_ge = picked[4:5, :]

    slot_row = lax.broadcasted_iota(jnp.int32, (1, R), 1).astype(f32)
    labels = jnp.where(slot_row < fg_this, sel_lab, 0.0)                    # bg labels -> 0

    # ---- twin_transform + normalization (constants folded) + inside/outside weights ----
    ex_len = sel_re - sel_rs + 1.0
    ex_ctr = sel_rs + 0.5 * ex_len
    g_len = sel_ge - sel_gs + 1.0
    g_ctr = sel_gs + 0.5 * g_len
    dx = (g_ctr - ex_ctr) / ex_len
    dl = jnp.log(g_len / ex_len)
    if TWIN_NORMALIZE_TARGETS_PRECOMPUTED:
        dx = (dx - TWIN_NORMALIZE_MEANS[0]) * _INV_STDS[0]
        dl = (dl - TWIN_NORMALIZE_MEANS[1]) * _INV_STDS[1]
    pos = (labels > 0.0).astype(f32)
    tt = jnp.concatenate([dx * pos, dl * pos], axis=0)                      # (2,R)
    tiw = jnp.concatenate([pos * TWIN_INSIDE_WEIGHTS[0],
                           pos * TWIN_INSIDE_WEIGHTS[1]], axis=0)           # (2,R)
    tow = (tiw > 0.0).astype(f32)

    bidx = jnp.zeros((1, R), f32) + pl.program_id(0).astype(f32)
    rois_ref[0] = jnp.concatenate([bidx, sel_rs, sel_re], axis=0).astype(rois_ref.dtype)
    lab_ref[0] = labels.astype(lab_ref.dtype)
    tt_ref[0] = tt.astype(tt_ref.dtype)
    tiw_ref[0] = tiw.astype(tiw_ref.dtype)
    tow_ref[0] = tow.astype(tow_ref.dtype)


# ===================================== wrapper =====================================
def proposal_target_layer(all_rois, gt_twins, num_classes=NUM_CLASSES):
    """Forward of _ProposalTargetLayer.

    all_rois : (B, N_rpn, 3) float  (batch_idx, start, end)
    gt_twins : (B, K, 3)     float  (start, end, class_label)  (zero rows = padding)
    Returns (rois, labels, twin_targets, twin_inside_weights, twin_outside_weights).
    """
    B = all_rois.shape[0]
    K = gt_twins.shape[1]
    dt = all_rois.dtype

    # append gt twins as extra proposals; go channel-major so num_rois sits on lanes
    roi_s = jnp.concatenate([all_rois[:, :, 1], gt_twins[:, :, 0]], axis=1)   # (B, N)
    roi_e = jnp.concatenate([all_rois[:, :, 2], gt_twins[:, :, 1]], axis=1)   # (B, N)
    roi_se = jnp.stack([roi_s, roi_e], axis=1)                                # (B, 2, N)
    gt_cm = jnp.transpose(gt_twins, (0, 2, 1))                                # (B, 3, K)
    N = roi_se.shape[2]

    rois_per_video = int(TRAIN_BATCH_SIZE / 1)                                # num_videos == 1
    fg_rois_per_video = int(round(FG_FRACTION * rois_per_video))
    fg_rois_per_video = 1 if fg_rois_per_video == 0 else fg_rois_per_video
    R = rois_per_video

    kernel = functools.partial(_ptl_kernel,
                               fg_per=float(fg_rois_per_video),
                               rois_per=float(rois_per_video))

    def blk(shape):
        return pl.BlockSpec((1,) + shape, lambda b: (b, 0, 0))

    rois_cm, lab_cm, tt_cm, tiw_cm, tow_cm = pl.pallas_call(
        kernel,
        out_shape=(jax.ShapeDtypeStruct((B, 3, R), dt),
                   jax.ShapeDtypeStruct((B, 1, R), dt),
                   jax.ShapeDtypeStruct((B, 2, R), dt),
                   jax.ShapeDtypeStruct((B, 2, R), dt),
                   jax.ShapeDtypeStruct((B, 2, R), dt)),
        grid=(B,),
        in_specs=[blk((2, N)), blk((3, K))],
        out_specs=(blk((3, R)), blk((1, R)), blk((2, R)), blk((2, R)), blk((2, R))),
        compiler_params=pltpu.CompilerParams(dimension_semantics=("parallel",)),
    )(roi_se, gt_cm)

    # tiny layout plumbing back to the reference interface
    rois = jnp.transpose(rois_cm, (0, 2, 1))            # (B, R, 3)
    labels = lab_cm[:, 0, :]                            # (B, R)
    twin_targets = jnp.transpose(tt_cm, (0, 2, 1))      # (B, R, 2)
    tiw = jnp.transpose(tiw_cm, (0, 2, 1))              # (B, R, 2)
    tow = jnp.transpose(tow_cm, (0, 2, 1))              # (B, R, 2)
    return rois, labels, twin_targets, tiw, tow


# ====================================== main ======================================
if __name__ == "__main__":
    B, N_rpn, K = 2, 20, 4
    key = jax.random.PRNGKey(0)
    k1, k2 = jax.random.split(key)
    starts = jax.random.uniform(k1, (B, N_rpn), minval=0.0, maxval=80.0)
    lens = jax.random.uniform(k2, (B, N_rpn), minval=2.0, maxval=40.0)
    all_rois = jnp.stack(
        [jnp.zeros((B, N_rpn)), starts, starts + lens], axis=2).astype(jnp.float32)

    gt_twins = jnp.array(
        [[[10., 40., 1.], [50., 70., 2.], [0., 0., 0.], [0., 0., 0.]],
         [[5., 25., 3.], [30., 60., 1.], [65., 90., 2.], [0., 0., 0.]]],
        dtype=jnp.float32)

    outs = jax.jit(proposal_target_layer)(all_rois, gt_twins)
    jax.block_until_ready(outs)

    rois, labels, twin_targets, tiw, tow = outs
    assert rois.shape == (B, TRAIN_BATCH_SIZE, 3)
    assert labels.shape == (B, TRAIN_BATCH_SIZE)
    assert twin_targets.shape == (B, TRAIN_BATCH_SIZE, 2)
    assert tiw.shape == (B, TRAIN_BATCH_SIZE, 2)
    assert tow.shape == (B, TRAIN_BATCH_SIZE, 2)
    assert bool(jnp.all(jnp.isfinite(twin_targets)))
    print("KERNEL_OK")
</pallas_src>

<mosaic_0001>
module attributes {stable_mosaic.version = 11 : i64} {
  func.func @_ptl_kernel(%arg0: i32, %arg1: memref<1x2x24xf32, #tpu.memory_space<vmem>>, %arg2: memref<1x3x4xf32, #tpu.memory_space<vmem>>, %arg3: memref<1x3x8xf32, #tpu.memory_space<vmem>>, %arg4: memref<1x1x8xf32, #tpu.memory_space<vmem>>, %arg5: memref<1x2x8xf32, #tpu.memory_space<vmem>>, %arg6: memref<1x2x8xf32, #tpu.memory_space<vmem>>, %arg7: memref<1x2x8xf32, #tpu.memory_space<vmem>>) attributes {dimension_semantics = [#tpu.dimension_semantics<parallel>], iteration_bounds = array<i64: 2>, scalar_prefetch = 0 : i64, scratch_operands = 0 : i64, tpu.core_type = #tpu.core_type<tc>, window_params = [{transform_indices = @transform_0, window_bounds = array<i64: 1, 2, 24>}, {transform_indices = @transform_1, window_bounds = array<i64: 1, 3, 4>}, {transform_indices = @transform_2, window_bounds = array<i64: 1, 3, 8>}, {transform_indices = @transform_3, window_bounds = array<i64: 1, 1, 8>}, {transform_indices = @transform_4, window_bounds = array<i64: 1, 2, 8>}, {transform_indices = @transform_5, window_bounds = array<i64: 1, 2, 8>}, {transform_indices = @transform_6, window_bounds = array<i64: 1, 2, 8>}]} {
    %c0 = arith.constant 0 : index
    %c0_0 = arith.constant 0 : index
    %c0_1 = arith.constant 0 : index
    %0 = vector.load %arg1[%c0, %c0_0, %c0_1] : memref<1x2x24xf32, #tpu.memory_space<vmem>>, vector<1x2x24xf32>
    %1 = vector.shape_cast %0 : vector<1x2x24xf32> to vector<2x24xf32>
    %c0_2 = arith.constant 0 : index
    %c0_3 = arith.constant 0 : index
    %c0_4 = arith.constant 0 : index
    %2 = vector.load %arg2[%c0_2, %c0_3, %c0_4] : memref<1x3x4xf32, #tpu.memory_space<vmem>>, vector<1x3x4xf32>
    %3 = vector.shape_cast %2 : vector<1x3x4xf32> to vector<3x4xf32>
    %4 = vector.extract_strided_slice %1 {offsets = [0, 0], sizes = [1, 24], strides = [1, 1]} : vector<2x24xf32> to vector<1x24xf32>
    %5 = vector.extract_strided_slice %1 {offsets = [1, 0], sizes = [1, 24], strides = [1, 1]} : vector<2x24xf32> to vector<1x24xf32>
    %6 = arith.subf %5, %4 : vector<1x24xf32>
    %cst = arith.constant 1.000000e+00 : f32
    %7 = vector.broadcast %cst : f32 to vector<1x24xf32>
    %8 = arith.addf %6, %7 : vector<1x24xf32>
    %cst_5 = arith.constant -1.000000e+30 : f32
    %9 = vector.broadcast %cst_5 : f32 to vector<1x24xf32>
    %cst_6 = arith.constant 0.000000e+00 : f32
    %10 = vector.broadcast %cst_6 : f32 to vector<1x24xf32>
    %cst_7 = arith.constant 0.000000e+00 : f32
    %11 = vector.broadcast %cst_7 : f32 to vector<1x24xf32>
    %cst_8 = arith.constant 0.000000e+00 : f32
    %12 = vector.broadcast %cst_8 : f32 to vector<1x24xf32>
    %13 = vector.extract_strided_slice %3 {offsets = [0, 0], sizes = [1, 1], strides = [1, 1]} : vector<3x4xf32> to vector<1x1xf32>
    %14 = vector.extract_strided_slice %3 {offsets = [1, 0], sizes = [1, 1], strides = [1, 1]} : vector<3x4xf32> to vector<1x1xf32>
    %15 = vector.extract_strided_slice %3 {offsets = [2, 0], sizes = [1, 1], strides = [1, 1]} : vector<3x4xf32> to vector<1x1xf32>
    %16 = arith.subf %14, %13 : vector<1x1xf32>
    %cst_9 = arith.constant 1.000000e+00 : f32
    %17 = vector.broadcast %cst_9 : f32 to vector<1x1xf32>
    %18 = arith.addf %16, %17 : vector<1x1xf32>
    %19 = vector.broadcast %14 : vector<1x1xf32> to vector<1x24xf32>
    %20 = arith.minimumf %5, %19 : vector<1x24xf32>
    %21 = vector.broadcast %13 : vector<1x1xf32> to vector<1x24xf32>
    %22 = arith.maximumf %4, %21 : vector<1x24xf32>
    %23 = arith.subf %20, %22 : vector<1x24xf32>
    %cst_10 = arith.constant 1.000000e+00 : f32
    %24 = vector.broadcast %cst_10 : f32 to vector<1x24xf32>
    %25 = arith.addf %23, %24 : vector<1x24xf32>
    %cst_11 = arith.constant 0.000000e+00 : f32
    %26 = vector.broadcast %cst_11 : f32 to vector<1x24xf32>
    %27 = arith.maximumf %25, %26 : vector<1x24xf32>
    %28 = vector.broadcast %18 : vector<1x1xf32> to vector<1x24xf32>
    %29 = arith.addf %8, %28 : vector<1x24xf32>
    %30 = arith.subf %29, %27 : vector<1x24xf32>
    %31 = arith.divf %27, %30 : vector<1x24xf32>
    %cst_12 = arith.constant 1.000000e+00 : f32
    %32 = vector.broadcast %cst_12 : f32 to vector<1x1xf32>
    %33 = arith.cmpf oeq, %18, %32 : vector<1x1xf32>
    %cst_13 = arith.constant 0.000000e+00 : f32
    %34 = vector.shape_cast %33 : vector<1x1xi1> to vector<1x1xi1>
    %35 = vector.broadcast %34 : vector<1x1xi1> to vector<1x24xi1>
    %36 = vector.broadcast %cst_13 : f32 to vector<1x24xf32>
    %37 = arith.select %35, %36, %31 : vector<1x24xi1>, vector<1x24xf32>
    %cst_14 = arith.constant 1.000000e+00 : f32
    %38 = vector.broadcast %cst_14 : f32 to vector<1x24xf32>
    %39 = arith.cmpf oeq, %8, %38 : vector<1x24xf32>
    %cst_15 = arith.constant -1.000000e+00 : f32
    %40 = vector.broadcast %cst_15 : f32 to vector<1x24xf32>
    %41 = arith.select %39, %40, %37 : vector<1x24xi1>, vector<1x24xf32>
    %42 = arith.cmpf ogt, %41, %9 : vector<1x24xf32>
    %43 = arith.select %42, %41, %9 : vector<1x24xi1>, vector<1x24xf32>
    %44 = vector.shape_cast %15 : vector<1x1xf32> to vector<1x1xf32>
    %45 = vector.broadcast %44 : vector<1x1xf32> to vector<1x24xf32>
    %46 = arith.select %42, %45, %10 : vector<1x24xi1>, vector<1x24xf32>
    %47 = vector.shape_cast %13 : vector<1x1xf32> to vector<1x1xf32>
    %48 = vector.broadcast %47 : vector<1x1xf32> to vector<1x24xf32>
    %49 = arith.select %42, %48, %11 : vector<1x24xi1>, vector<1x24xf32>
    %50 = vector.shape_cast %14 : vector<1x1xf32> to vector<1x1xf32>
    %51 = vector.broadcast %50 : vector<1x1xf32> to vector<1x24xf32>
    %52 = arith.select %42, %51, %12 : vector<1x24xi1>, vector<1x24xf32>
    %53 = vector.extract_strided_slice %3 {offsets = [0, 1], sizes = [1, 1], strides = [1, 1]} : vector<3x4xf32> to vector<1x1xf32>
    %54 = vector.extract_strided_slice %3 {offsets = [1, 1], sizes = [1, 1], strides = [1, 1]} : vector<3x4xf32> to vector<1x1xf32>
    %55 = vector.extract_strided_slice %3 {offsets = [2, 1], sizes = [1, 1], strides = [1, 1]} : vector<3x4xf32> to vector<1x1xf32>
    %56 = arith.subf %54, %53 : vector<1x1xf32>
    %cst_16 = arith.constant 1.000000e+00 : f32
    %57 = vector.broadcast %cst_16 : f32 to vector<1x1xf32>
    %58 = arith.addf %56, %57 : vector<1x1xf32>
    %59 = vector.broadcast %54 : vector<1x1xf32> to vector<1x24xf32>
    %60 = arith.minimumf %5, %59 : vector<1x24xf32>
    %61 = vector.broadcast %53 : vector<1x1xf32> to vector<1x24xf32>
    %62 = arith.maximumf %4, %61 : vector<1x24xf32>
    %63 = arith.subf %60, %62 : vector<1x24xf32>
    %cst_17 = arith.constant 1.000000e+00 : f32
    %64 = vector.broadcast %cst_17 : f32 to vector<1x24xf32>
    %65 = arith.addf %63, %64 : vector<1x24xf32>
    %cst_18 = arith.constant 0.000000e+00 : f32
    %66 = vector.broadcast %cst_18 : f32 to vector<1x24xf32>
    %67 = arith.maximumf %65, %66 : vector<1x24xf32>
    %68 = vector.broadcast %58 : vector<1x1xf32> to vector<1x24xf32>
    %69 = arith.addf %8, %68 : vector<1x24xf32>
    %70 = arith.subf %69, %67 : vector<1x24xf32>
    %71 = arith.divf %67, %70 : vector<1x24xf32>
    %cst_19 = arith.constant 1.000000e+00 : f32
    %72 = vector.broadcast %cst_19 : f32 to vector<1x1xf32>
    %73 = arith.cmpf oeq, %58, %72 : vector<1x1xf32>
    %cst_20 = arith.constant 0.000000e+00 : f32
    %74 = vector.shape_cast %73 : vector<1x1xi1> to vector<1x1xi1>
    %75 = vector.broadcast %74 : vector<1x1xi1> to vector<1x24xi1>
    %76 = vector.broadcast %cst_20 : f32 to vector<1x24xf32>
    %77 = arith.select %75, %76, %71 : vector<1x24xi1>, vector<1x24xf32>
    %cst_21 = arith.constant 1.000000e+00 : f32
    %78 = vector.broadcast %cst_21 : f32 to vector<1x24xf32>
    %79 = arith.cmpf oeq, %8, %78 : vector<1x24xf32>
    %cst_22 = arith.constant -1.000000e+00 : f32
    %80 = vector.broadcast %cst_22 : f32 to vector<1x24xf32>
    %81 = arith.select %79, %80, %77 : vector<1x24xi1>, vector<1x24xf32>
    %82 = arith.cmpf ogt, %81, %43 : vector<1x24xf32>
    %83 = arith.select %82, %81, %43 : vector<1x24xi1>, vector<1x24xf32>
    %84 = vector.shape_cast %55 : vector<1x1xf32> to vector<1x1xf32>
    %85 = vector.broadcast %84 : vector<1x1xf32> to vector<1x24xf32>
    %86 = arith.select %82, %85, %46 : vector<1x24xi1>, vector<1x24xf32>
    %87 = vector.shape_cast %53 : vector<1x1xf32> to vector<1x1xf32>
    %88 = vector.broadcast %87 : vector<1x1xf32> to vector<1x24xf32>
    %89 = arith.select %82, %88, %49 : vector<1x24xi1>, vector<1x24xf32>
    %90 = vector.shape_cast %54 : vector<1x1xf32> to vector<1x1xf32>
    %91 = vector.broadcast %90 : vector<1x1xf32> to vector<1x24xf32>
    %92 = arith.select %82, %91, %52 : vector<1x24xi1>, vector<1x24xf32>
    %93 = vector.extract_strided_slice %3 {offsets = [0, 2], sizes = [1, 1], strides = [1, 1]} : vector<3x4xf32> to vector<1x1xf32>
    %94 = vector.extract_strided_slice %3 {offsets = [1, 2], sizes = [1, 1], strides = [1, 1]} : vector<3x4xf32> to vector<1x1xf32>
    %95 = vector.extract_strided_slice %3 {offsets = [2, 2], sizes = [1, 1], strides = [1, 1]} : vector<3x4xf32> to vector<1x1xf32>
    %96 = arith.subf %94, %93 : vector<1x1xf32>
    %cst_23 = arith.constant 1.000000e+00 : f32
    %97 = vector.broadcast %cst_23 : f32 to vector<1x1xf32>
    %98 = arith.addf %96, %97 : vector<1x1xf32>
    %99 = vector.broadcast %94 : vector<1x1xf32> to vector<1x24xf32>
    %100 = arith.minimumf %5, %99 : vector<1x24xf32>
    %101 = vector.broadcast %93 : vector<1x1xf32> to vector<1x24xf32>
    %102 = arith.maximumf %4, %101 : vector<1x24xf32>
    %103 = arith.subf %100, %102 : vector<1x24xf32>
    %cst_24 = arith.constant 1.000000e+00 : f32
    %104 = vector.broadcast %cst_24 : f32 to vector<1x24xf32>
    %105 = arith.addf %103, %104 : vector<1x24xf32>
    %cst_25 = arith.constant 0.000000e+00 : f32
    %106 = vector.broadcast %cst_25 : f32 to vector<1x24xf32>
    %107 = arith.maximumf %105, %106 : vector<1x24xf32>
    %108 = vector.broadcast %98 : vector<1x1xf32> to vector<1x24xf32>
    %109 = arith.addf %8, %108 : vector<1x24xf32>
    %110 = arith.subf %109, %107 : vector<1x24xf32>
    %111 = arith.divf %107, %110 : vector<1x24xf32>
    %cst_26 = arith.constant 1.000000e+00 : f32
    %112 = vector.broadcast %cst_26 : f32 to vector<1x1xf32>
    %113 = arith.cmpf oeq, %98, %112 : vector<1x1xf32>
    %cst_27 = arith.constant 0.000000e+00 : f32
    %114 = vector.shape_cast %113 : vector<1x1xi1> to vector<1x1xi1>
    %115 = vector.broadcast %114 : vector<1x1xi1> to vector<1x24xi1>
    %116 = vector.broadcast %cst_27 : f32 to vector<1x24xf32>
    %117 = arith.select %115, %116, %111 : vector<1x24xi1>, vector<1x24xf32>
    %cst_28 = arith.constant 1.000000e+00 : f32
    %118 = vector.broadcast %cst_28 : f32 to vector<1x24xf32>
    %119 = arith.cmpf oeq, %8, %118 : vector<1x24xf32>
    %cst_29 = arith.constant -1.000000e+00 : f32
    %120 = vector.broadcast %cst_29 : f32 to vector<1x24xf32>
    %121 = arith.select %119, %120, %117 : vector<1x24xi1>, vector<1x24xf32>
    %122 = arith.cmpf ogt, %121, %83 : vector<1x24xf32>
    %123 = arith.select %122, %121, %83 : vector<1x24xi1>, vector<1x24xf32>
    %124 = vector.shape_cast %95 : vector<1x1xf32> to vector<1x1xf32>
    %125 = vector.broadcast %124 : vector<1x1xf32> to vector<1x24xf32>
    %126 = arith.select %122, %125, %86 : vector<1x24xi1>, vector<1x24xf32>
    %127 = vector.shape_cast %93 : vector<1x1xf32> to vector<1x1xf32>
    %128 = vector.broadcast %127 : vector<1x1xf32> to vector<1x24xf32>
    %129 = arith.select %122, %128, %89 : vector<1x24xi1>, vector<1x24xf32>
    %130 = vector.shape_cast %94 : vector<1x1xf32> to vector<1x1xf32>
    %131 = vector.broadcast %130 : vector<1x1xf32> to vector<1x24xf32>
    %132 = arith.select %122, %131, %92 : vector<1x24xi1>, vector<1x24xf32>
    %133 = vector.extract_strided_slice %3 {offsets = [0, 3], sizes = [1, 1], strides = [1, 1]} : vector<3x4xf32> to vector<1x1xf32>
    %134 = vector.extract_strided_slice %3 {offsets = [1, 3], sizes = [1, 1], strides = [1, 1]} : vector<3x4xf32> to vector<1x1xf32>
    %135 = vector.extract_strided_slice %3 {offsets = [2, 3], sizes = [1, 1], strides = [1, 1]} : vector<3x4xf32> to vector<1x1xf32>
    %136 = arith.subf %134, %133 : vector<1x1xf32>
    %cst_30 = arith.constant 1.000000e+00 : f32
    %137 = vector.broadcast %cst_30 : f32 to vector<1x1xf32>
    %138 = arith.addf %136, %137 : vector<1x1xf32>
    %139 = vector.broadcast %134 : vector<1x1xf32> to vector<1x24xf32>
    %140 = arith.minimumf %5, %139 : vector<1x24xf32>
    %141 = vector.broadcast %133 : vector<1x1xf32> to vector<1x24xf32>
    %142 = arith.maximumf %4, %141 : vector<1x24xf32>
    %143 = arith.subf %140, %142 : vector<1x24xf32>
    %cst_31 = arith.constant 1.000000e+00 : f32
    %144 = vector.broadcast %cst_31 : f32 to vector<1x24xf32>
    %145 = arith.addf %143, %144 : vector<1x24xf32>
    %cst_32 = arith.constant 0.000000e+00 : f32
    %146 = vector.broadcast %cst_32 : f32 to vector<1x24xf32>
    %147 = arith.maximumf %145, %146 : vector<1x24xf32>
    %148 = vector.broadcast %138 : vector<1x1xf32> to vector<1x24xf32>
    %149 = arith.addf %8, %148 : vector<1x24xf32>
    %150 = arith.subf %149, %147 : vector<1x24xf32>
    %151 = arith.divf %147, %150 : vector<1x24xf32>
    %cst_33 = arith.constant 1.000000e+00 : f32
    %152 = vector.broadcast %cst_33 : f32 to vector<1x1xf32>
    %153 = arith.cmpf oeq, %138, %152 : vector<1x1xf32>
    %cst_34 = arith.constant 0.000000e+00 : f32
    %154 = vector.shape_cast %153 : vector<1x1xi1> to vector<1x1xi1>
    %155 = vector.broadcast %154 : vector<1x1xi1> to vector<1x24xi1>
    %156 = vector.broadcast %cst_34 : f32 to vector<1x24xf32>
    %157 = arith.select %155, %156, %151 : vector<1x24xi1>, vector<1x24xf32>
    %cst_35 = arith.constant 1.000000e+00 : f32
    %158 = vector.broadcast %cst_35 : f32 to vector<1x24xf32>
    %159 = arith.cmpf oeq, %8, %158 : vector<1x24xf32>
    %cst_36 = arith.constant -1.000000e+00 : f32
    %160 = vector.broadcast %cst_36 : f32 to vector<1x24xf32>
    %161 = arith.select %159, %160, %157 : vector<1x24xi1>, vector<1x24xf32>
    %162 = arith.cmpf ogt, %161, %123 : vector<1x24xf32>
    %163 = arith.select %162, %161, %123 : vector<1x24xi1>, vector<1x24xf32>
    %164 = vector.shape_cast %135 : vector<1x1xf32> to vector<1x1xf32>
    %165 = vector.broadcast %164 : vector<1x1xf32> to vector<1x24xf32>
    %166 = arith.select %162, %165, %126 : vector<1x24xi1>, vector<1x24xf32>
    %167 = vector.shape_cast %133 : vector<1x1xf32> to vector<1x1xf32>
    %168 = vector.broadcast %167 : vector<1x1xf32> to vector<1x24xf32>
    %169 = arith.select %162, %168, %129 : vector<1x24xi1>, vector<1x24xf32>
    %170 = vector.shape_cast %134 : vector<1x1xf32> to vector<1x1xf32>
    %171 = vector.broadcast %170 : vector<1x1xf32> to vector<1x24xf32>
    %172 = arith.select %162, %171, %132 : vector<1x24xi1>, vector<1x24xf32>
    %cst_37 = arith.constant 5.000000e-01 : f32
    %173 = vector.broadcast %cst_37 : f32 to vector<1x24xf32>
    %174 = arith.cmpf oge, %163, %173 : vector<1x24xf32>
    %175 = arith.extui %174 : vector<1x24xi1> to vector<1x24xi32>
    %176 = arith.sitofp %175 : vector<1x24xi32> to vector<1x24xf32>
    %cst_38 = arith.constant 5.000000e-01 : f32
    %177 = vector.broadcast %cst_38 : f32 to vector<1x24xf32>
    %178 = arith.cmpf olt, %163, %177 : vector<1x24xf32>
    %cst_39 = arith.constant 0.000000e+00 : f32
    %179 = vector.broadcast %cst_39 : f32 to vector<1x24xf32>
    %180 = arith.cmpf oge, %163, %179 : vector<1x24xf32>
    %181 = arith.andi %178, %180 : vector<1x24xi1>
    %182 = arith.extui %181 : vector<1x24xi1> to vector<1x24xi32>
    %183 = arith.sitofp %182 : vector<1x24xi32> to vector<1x24xf32>
    %cst_40 = arith.constant dense<0.000000e+00> : vector<1xf32>
    %184 = vector.multi_reduction <add>, %176, %cst_40 [1] : vector<1x24xf32> to vector<1xf32>
    %185 = vector.shape_cast %184 : vector<1xf32> to vector<1x1xf32>
    %cst_41 = arith.constant dense<0.000000e+00> : vector<1xf32>
    %186 = vector.multi_reduction <add>, %183, %cst_41 [1] : vector<1x24xf32> to vector<1xf32>
    %187 = vector.shape_cast %186 : vector<1xf32> to vector<1x1xf32>
    %188 = tpu.iota {dimensions = array<i32: 0>} : vector<24x24xi32>
    %189 = tpu.iota {dimensions = array<i32: 1>} : vector<24x24xi32>
    %190 = arith.cmpi sle, %188, %189 : vector<24x24xi32>
    %191 = arith.extui %190 : vector<24x24xi1> to vector<24x24xi32>
    %192 = arith.sitofp %191 : vector<24x24xi32> to vector<24x24xf32>
    %193 = tpu.concatenate %176, %183 in 0 : vector<1x24xf32>, vector<1x24xf32> -> vector<2x24xf32>
    %cst_42 = arith.constant dense<0.000000e+00> : vector<2x24xf32>
    %194 = tpu.matmul %193, %192, %cst_42 {dimension_numbers = #tpu.dot_dimension_numbers<[1], [0], [0], [1], [0, 0, 1, 1], [], []>} : vector<2x24xf32>, vector<24x24xf32>, vector<2x24xf32> -> vector<2x24xf32>
    %cst_43 = arith.constant 1.000000e+00 : f32
    %195 = vector.broadcast %cst_43 : f32 to vector<2x24xf32>
    %196 = arith.subf %194, %195 : vector<2x24xf32>
    %197 = vector.extract_strided_slice %196 {offsets = [0, 0], sizes = [1, 24], strides = [1, 1]} : vector<2x24xf32> to vector<1x24xf32>
    %198 = vector.extract_strided_slice %196 {offsets = [1, 0], sizes = [1, 24], strides = [1, 1]} : vector<2x24xf32> to vector<1x24xf32>
    %cst_44 = arith.constant 0.000000e+00 : f32
    %199 = vector.broadcast %cst_44 : f32 to vector<1x1xf32>
    %200 = arith.cmpf ogt, %185, %199 : vector<1x1xf32>
    %cst_45 = arith.constant 0.000000e+00 : f32
    %201 = vector.broadcast %cst_45 : f32 to vector<1x1xf32>
    %202 = arith.cmpf ogt, %187, %201 : vector<1x1xf32>
    %cst_46 = arith.constant 2.000000e+00 : f32
    %203 = vector.broadcast %cst_46 : f32 to vector<1x1xf32>
    %204 = arith.minimumf %203, %185 : vector<1x1xf32>
    %cst_47 = arith.constant 8.000000e+00 : f32
    %205 = vector.broadcast %cst_47 : f32 to vector<1x1xf32>
    %206 = arith.select %202, %204, %205 : vector<1x1xi1>, vector<1x1xf32>
    %cst_48 = arith.constant 0.000000e+00 : f32
    %207 = vector.broadcast %cst_48 : f32 to vector<1x1xf32>
    %208 = arith.select %200, %206, %207 : vector<1x1xi1>, vector<1x1xf32>
    %209 = tpu.iota {dimensions = array<i32: 0>} : vector<8x1xi32>
    %210 = arith.sitofp %209 : vector<8x1xi32> to vector<8x1xf32>
    %cst_49 = arith.constant 1.000000e+00 : f32
    %211 = vector.broadcast %cst_49 : f32 to vector<1x1xf32>
    %212 = arith.maximumf %185, %211 : vector<1x1xf32>
    %cst_50 = arith.constant 1.000000e+00 : f32
    %213 = vector.broadcast %cst_50 : f32 to vector<1x1xf32>
    %214 = arith.maximumf %187, %213 : vector<1x1xf32>
    %215 = vector.broadcast %212 : vector<1x1xf32> to vector<8x1xf32>
    %216 = arith.divf %210, %215 : vector<8x1xf32>
    %217 = math.floor %216 : vector<8x1xf32>
    %218 = vector.broadcast %212 : vector<1x1xf32> to vector<8x1xf32>
    %219 = arith.mulf %218, %217 : vector<8x1xf32>
    %220 = arith.subf %210, %219 : vector<8x1xf32>
    %221 = vector.broadcast %208 : vector<1x1xf32> to vector<8x1xf32>
    %222 = arith.subf %210, %221 : vector<8x1xf32>
    %cst_51 = arith.constant 0.000000e+00 : f32
    %223 = vector.broadcast %cst_51 : f32 to vector<8x1xf32>
    %224 = arith.maximumf %222, %223 : vector<8x1xf32>
    %225 = vector.broadcast %214 : vector<1x1xf32> to vector<8x1xf32>
    %226 = arith.divf %224, %225 : vector<8x1xf32>
    %227 = math.floor %226 : vector<8x1xf32>
    %228 = vector.broadcast %214 : vector<1x1xf32> to vector<8x1xf32>
    %229 = arith.mulf %228, %227 : vector<8x1xf32>
    %230 = arith.subf %224, %229 : vector<8x1xf32>
    %231 = vector.broadcast %208 : vector<1x1xf32> to vector<8x1xf32>
    %232 = arith.cmpf olt, %210, %231 : vector<8x1xf32>
    %233 = vector.broadcast %197 : vector<1x24xf32> to vector<8x24xf32>
    %234 = vector.broadcast %220 : vector<8x1xf32> to vector<8x24xf32>
    %235 = arith.cmpf oeq, %233, %234 : vector<8x24xf32>
    %cst_52 = arith.constant 0.000000e+00 : f32
    %236 = vector.shape_cast %176 : vector<1x24xf32> to vector<1x24xf32>
    %237 = vector.broadcast %236 : vector<1x24xf32> to vector<8x24xf32>
    %238 = vector.broadcast %cst_52 : f32 to vector<8x24xf32>
    %239 = arith.select %235, %237, %238 : vector<8x24xi1>, vector<8x24xf32>
    %240 = vector.broadcast %198 : vector<1x24xf32> to vector<8x24xf32>
    %241 = vector.broadcast %230 : vector<8x1xf32> to vector<8x24xf32>
    %242 = arith.cmpf oeq, %240, %241 : vector<8x24xf32>
    %cst_53 = arith.constant 0.000000e+00 : f32
    %243 = vector.shape_cast %183 : vector<1x24xf32> to vector<1x24xf32>
    %244 = vector.broadcast %243 : vector<1x24xf32> to vector<8x24xf32>
    %245 = vector.broadcast %cst_53 : f32 to vector<8x24xf32>
    %246 = arith.select %242, %244, %245 : vector<8x24xi1>, vector<8x24xf32>
    %247 = vector.shape_cast %232 : vector<8x1xi1> to vector<8x1xi1>
    %248 = vector.broadcast %247 : vector<8x1xi1> to vector<8x24xi1>
    %249 = arith.select %248, %239, %246 : vector<8x24xi1>, vector<8x24xf32>
    %250 = tpu.concatenate %4, %5, %166, %169, %172 in 0 : vector<1x24xf32>, vector<1x24xf32>, vector<1x24xf32>, vector<1x24xf32>, vector<1x24xf32> -> vector<5x24xf32>
    %cst_54 = arith.constant dense<0.000000e+00> : vector<5x8xf32>
    %251 = tpu.matmul %250, %249, %cst_54 {dimension_numbers = #tpu.dot_dimension_numbers<[1], [1], [0], [0], [0, 0, 1, 0], [], []>} : vector<5x24xf32>, vector<8x24xf32>, vector<5x8xf32> -> vector<5x8xf32>
    %252 = vector.extract_strided_slice %251 {offsets = [0, 0], sizes = [1, 8], strides = [1, 1]} : vector<5x8xf32> to vector<1x8xf32>
    %253 = vector.extract_strided_slice %251 {offsets = [1, 0], sizes = [1, 8], strides = [1, 1]} : vector<5x8xf32> to vector<1x8xf32>
    %254 = vector.extract_strided_slice %251 {offsets = [2, 0], sizes = [1, 8], strides = [1, 1]} : vector<5x8xf32> to vector<1x8xf32>
    %255 = vector.extract_strided_slice %251 {offsets = [3, 0], sizes = [1, 8], strides = [1, 1]} : vector<5x8xf32> to vector<1x8xf32>
    %256 = vector.extract_strided_slice %251 {offsets = [4, 0], sizes = [1, 8], strides = [1, 1]} : vector<5x8xf32> to vector<1x8xf32>
    %257 = tpu.iota {dimensions = array<i32: 1>} : vector<1x8xi32>
    %258 = arith.sitofp %257 : vector<1x8xi32> to vector<1x8xf32>
    %259 = vector.broadcast %208 : vector<1x1xf32> to vector<1x8xf32>
    %260 = arith.cmpf olt, %258, %259 : vector<1x8xf32>
    %cst_55 = arith.constant 0.000000e+00 : f32
    %261 = vector.broadcast %cst_55 : f32 to vector<1x8xf32>
    %262 = arith.select %260, %254, %261 : vector<1x8xi1>, vector<1x8xf32>
    %263 = arith.subf %253, %252 : vector<1x8xf32>
    %cst_56 = arith.constant 1.000000e+00 : f32
    %264 = vector.broadcast %cst_56 : f32 to vector<1x8xf32>
    %265 = arith.addf %263, %264 : vector<1x8xf32>
    %cst_57 = arith.constant 5.000000e-01 : f32
    %266 = vector.broadcast %cst_57 : f32 to vector<1x8xf32>
    %267 = arith.mulf %266, %265 : vector<1x8xf32>
    %268 = arith.addf %252, %267 : vector<1x8xf32>
    %269 = arith.subf %256, %255 : vector<1x8xf32>
    %cst_58 = arith.constant 1.000000e+00 : f32
    %270 = vector.broadcast %cst_58 : f32 to vector<1x8xf32>
    %271 = arith.addf %269, %270 : vector<1x8xf32>
    %cst_59 = arith.constant 5.000000e-01 : f32
    %272 = vector.broadcast %cst_59 : f32 to vector<1x8xf32>
    %273 = arith.mulf %272, %271 : vector<1x8xf32>
    %274 = arith.addf %255, %273 : vector<1x8xf32>
    %275 = arith.subf %274, %268 : vector<1x8xf32>
    %276 = arith.divf %275, %265 : vector<1x8xf32>
    %277 = arith.divf %271, %265 : vector<1x8xf32>
    %278 = math.log %277 : vector<1x8xf32>
    %cst_60 = arith.constant 0.000000e+00 : f32
    %279 = vector.broadcast %cst_60 : f32 to vector<1x8xf32>
    %280 = arith.subf %276, %279 : vector<1x8xf32>
    %cst_61 = arith.constant 1.000000e+01 : f32
    %281 = vector.broadcast %cst_61 : f32 to vector<1x8xf32>
    %282 = arith.mulf %280, %281 : vector<1x8xf32>
    %cst_62 = arith.constant 0.000000e+00 : f32
    %283 = vector.broadcast %cst_62 : f32 to vector<1x8xf32>
    %284 = arith.subf %278, %283 : vector<1x8xf32>
    %cst_63 = arith.constant 5.000000e+00 : f32
    %285 = vector.broadcast %cst_63 : f32 to vector<1x8xf32>
    %286 = arith.mulf %284, %285 : vector<1x8xf32>
    %cst_64 = arith.constant 0.000000e+00 : f32
    %287 = vector.broadcast %cst_64 : f32 to vector<1x8xf32>
    %288 = arith.cmpf ogt, %262, %287 : vector<1x8xf32>
    %289 = arith.extui %288 : vector<1x8xi1> to vector<1x8xi32>
    %290 = arith.sitofp %289 : vector<1x8xi32> to vector<1x8xf32>
    %291 = arith.mulf %282, %290 : vector<1x8xf32>
    %292 = arith.mulf %286, %290 : vector<1x8xf32>
    %293 = tpu.concatenate %291, %292 in 0 : vector<1x8xf32>, vector<1x8xf32> -> vector<2x8xf32>
    %cst_65 = arith.constant 1.000000e+00 : f32
    %294 = vector.broadcast %cst_65 : f32 to vector<1x8xf32>
    %295 = arith.mulf %290, %294 : vector<1x8xf32>
    %cst_66 = arith.constant 1.000000e+00 : f32
    %296 = vector.broadcast %cst_66 : f32 to vector<1x8xf32>
    %297 = arith.mulf %290, %296 : vector<1x8xf32>
    %298 = tpu.concatenate %295, %297 in 0 : vector<1x8xf32>, vector<1x8xf32> -> vector<2x8xf32>
    %cst_67 = arith.constant 0.000000e+00 : f32
    %299 = vector.broadcast %cst_67 : f32 to vector<2x8xf32>
    %300 = arith.cmpf ogt, %298, %299 : vector<2x8xf32>
    %301 = arith.extui %300 : vector<2x8xi1> to vector<2x8xi32>
    %302 = arith.sitofp %301 : vector<2x8xi32> to vector<2x8xf32>
    %cst_68 = arith.constant 0.000000e+00 : f32
    %303 = vector.broadcast %cst_68 : f32 to vector<1x8xf32>
    %304 = arith.sitofp %arg0 : i32 to f32
    %305 = vector.broadcast %304 : f32 to vector<1x8xf32>
    %306 = arith.addf %303, %305 : vector<1x8xf32>
    %307 = tpu.concatenate %306, %252, %253 in 0 : vector<1x8xf32>, vector<1x8xf32>, vector<1x8xf32> -> vector<3x8xf32>
    %c0_69 = arith.constant 0 : index
    %c0_70 = arith.constant 0 : index
    %c0_71 = arith.constant 0 : index
    %308 = vector.load %arg3[%c0_69, %c0_70, %c0_71] : memref<1x3x8xf32, #tpu.memory_space<vmem>>, vector<1x3x8xf32>
    %309 = vector.shape_cast %308 : vector<1x3x8xf32> to vector<3x8xf32>
    %310 = vector.shape_cast %307 : vector<3x8xf32> to vector<1x3x8xf32>
    tpu.vector_store %arg3[%c0_69, %c0_70, %c0_71], %310 {strides = array<i32>} : memref<1x3x8xf32, #tpu.memory_space<vmem>>, vector<1x3x8xf32>,
    %c0_72 = arith.constant 0 : index
    %c0_73 = arith.constant 0 : index
    %c0_74 = arith.constant 0 : index
    %311 = vector.load %arg4[%c0_72, %c0_73, %c0_74] : memref<1x1x8xf32, #tpu.memory_space<vmem>>, vector<1x1x8xf32>
    %312 = vector.shape_cast %311 : vector<1x1x8xf32> to vector<1x8xf32>
    %313 = vector.shape_cast %262 : vector<1x8xf32> to vector<1x1x8xf32>
    tpu.vector_store %arg4[%c0_72, %c0_73, %c0_74], %313 {strides = array<i32>} : memref<1x1x8xf32, #tpu.memory_space<vmem>>, vector<1x1x8xf32>,
    %c0_75 = arith.constant 0 : index
    %c0_76 = arith.constant 0 : index
    %c0_77 = arith.constant 0 : index
    %314 = vector.load %arg5[%c0_75, %c0_76, %c0_77] : memref<1x2x8xf32, #tpu.memory_space<vmem>>, vector<1x2x8xf32>
    %315 = vector.shape_cast %314 : vector<1x2x8xf32> to vector<2x8xf32>
    %316 = vector.shape_cast %293 : vector<2x8xf32> to vector<1x2x8xf32>
    tpu.vector_store %arg5[%c0_75, %c0_76, %c0_77], %316 {strides = array<i32>} : memref<1x2x8xf32, #tpu.memory_space<vmem>>, vector<1x2x8xf32>,
    %c0_78 = arith.constant 0 : index
    %c0_79 = arith.constant 0 : index
    %c0_80 = arith.constant 0 : index
    %317 = vector.load %arg6[%c0_78, %c0_79, %c0_80] : memref<1x2x8xf32, #tpu.memory_space<vmem>>, vector<1x2x8xf32>
    %318 = vector.shape_cast %317 : vector<1x2x8xf32> to vector<2x8xf32>
    %319 = vector.shape_cast %298 : vector<2x8xf32> to vector<1x2x8xf32>
    tpu.vector_store %arg6[%c0_78, %c0_79, %c0_80], %319 {strides = array<i32>} : memref<1x2x8xf32, #tpu.memory_space<vmem>>, vector<1x2x8xf32>,
    %c0_81 = arith.constant 0 : index
    %c0_82 = arith.constant 0 : index
    %c0_83 = arith.constant 0 : index
    %320 = vector.load %arg7[%c0_81, %c0_82, %c0_83] : memref<1x2x8xf32, #tpu.memory_space<vmem>>, vector<1x2x8xf32>
    %321 = vector.shape_cast %320 : vector<1x2x8xf32> to vector<2x8xf32>
    %322 = vector.shape_cast %302 : vector<2x8xf32> to vector<1x2x8xf32>
    tpu.vector_store %arg7[%c0_81, %c0_82, %c0_83], %322 {strides = array<i32>} : memref<1x2x8xf32, #tpu.memory_space<vmem>>, vector<1x2x8xf32>,
    return
  }
  func.func @transform_0(%arg0: i32) -> (i32, i32, i32) {
    %c0_i32 = arith.constant 0 : i32
    %c0_i32_0 = arith.constant 0 : i32
    %c0_i32_1 = arith.constant 0 : i32
    return %arg0, %c0_i32, %c0_i32_0 : i32, i32, i32
  }
  func.func @transform_1(%arg0: i32) -> (i32, i32, i32) {
    %c0_i32 = arith.constant 0 : i32
    %c0_i32_0 = arith.constant 0 : i32
    %c0_i32_1 = arith.constant 0 : i32
    return %arg0, %c0_i32, %c0_i32_0 : i32, i32, i32
  }
  func.func @transform_2(%arg0: i32) -> (i32, i32, i32) {
    %c0_i32 = arith.constant 0 : i32
    %c0_i32_0 = arith.constant 0 : i32
    %c0_i32_1 = arith.constant 0 : i32
    return %arg0, %c0_i32, %c0_i32_0 : i32, i32, i32
  }
  func.func @transform_3(%arg0: i32) -> (i32, i32, i32) {
    %c0_i32 = arith.constant 0 : i32
    %c0_i32_0 = arith.constant 0 : i32
    %c0_i32_1 = arith.constant 0 : i32
    return %arg0, %c0_i32, %c0_i32_0 : i32, i32, i32
  }
  func.func @transform_4(%arg0: i32) -> (i32, i32, i32) {
    %c0_i32 = arith.constant 0 : i32
    %c0_i32_0 = arith.constant 0 : i32
    %c0_i32_1 = arith.constant 0 : i32
    return %arg0, %c0_i32, %c0_i32_0 : i32, i32, i32
  }
  func.func @transform_5(%arg0: i32) -> (i32, i32, i32) {
    %c0_i32 = arith.constant 0 : i32
    %c0_i32_0 = arith.constant 0 : i32
    %c0_i32_1 = arith.constant 0 : i32
    return %arg0, %c0_i32, %c0_i32_0 : i32, i32, i32
  }
  func.func @transform_6(%arg0: i32) -> (i32, i32, i32) {
    %c0_i32 = arith.constant 0 : i32
    %c0_i32_0 = arith.constant 0 : i32
    %c0_i32_1 = arith.constant 0 : i32
    return %arg0, %c0_i32, %c0_i32_0 : i32, i32, i32
  }
}

</mosaic_0001>

<bundles_post_ra>
// kernel: proposal_target_layer.1
= control target key start
LH: loop header
LB: loop body
LE: loop exit
PB: predicated region body
PF: predicated region fallthrough
CT: control target
= control target key end

     0   :  { %12 = vsyncpa [#allocation3], 0  ;;  %s1716_s0 = inlined_call_operand.vmem [shape: f32[2,2,24], index: 0, kind: input, shape index: {}]   ;;  %s1717_s1 = inlined_call_operand.vmem [shape: f32[2,3,4], index: 1, kind: input, shape index: {}]   ;;  %s1718_s2 = inlined_call_operand.vmem [shape: f32[2,3,8], index: 2, kind: output, shape index: {0}]   ;;  %s1719_s3 = inlined_call_operand.hbm [shape: f32[2,1,8], index: 3, kind: output, shape index: {1}]   ;;  %s1720_s4 = inlined_call_operand.hbm [shape: f32[2,2,8], index: 4, kind: output, shape index: {2}]   ;;  %s1721_s5 = inlined_call_operand.hbm [shape: f32[2,2,8], index: 5, kind: output, shape index: {3}]   ;;  %s1722_s6 = inlined_call_operand.hbm [shape: f32[2,2,8], index: 6, kind: output, shape index: {4}]  }
   0x1   :  { %14 = vsyncpa [#allocation3 + $0x1], 0 }
   0x2   :  { %15 = vsyncpa [#allocation5], 0 }
   0x3   :  { %17 = vsyncpa [#allocation5 + $0x1], 0 }
   0x4   :  { %18 = vsyncpa [#allocation8], 0 }
   0x5   :  { %20 = vsyncpa [#allocation8 + $0x1], 0  ;;  %s1349_s21 = smov 0   ;;  %s1351_s22 = smov 0  }
   0x6   :  { %s1353_s23 = smov 0   ;;  %s1355_s24 = smov 0  }
   0x7 LB: > { %s1370_s25 = sadd.s32 4294967295, %s1306_s24   ;;  %s1723_s26 = sadd.s32 4294967294, %s1306_s24   ;;  %s1306_s24 = sphi %s1355_s24, %s1732_s24   ;;  %s1302_s23 = sphi %s1353_s23, %s1731_s23   ;;  %s1298_s22 = sphi %s1351_s22, %s1730_s22   ;;  %s1294_s21 = sphi %s1349_s21, %s1729_s21  }
   0x8   : > { %s1374_s27 = sadd.s32 1, %s1306_s24   ;;  %s111_s28 = sadd.s32 1, %s1302_s23 }
   0x9   : > { %s108_s29 = ssub.s32 %s1306_s24, %s1374_s27  ;;  %p121_p0 = scmp.ne.s32.totalorder %s1302_s23, %s1298_s22 }
   0xa   : > { %p109_p1 = scmp.eq.s32.totalorder %s108_s29, 0  ;;  %p122_p2 = scmp.eq.s32.totalorder %s1370_s25, 1 }
   0xb   : > { %p127_p3 = scmp.ne.s32.totalorder %s1298_s22, %s1294_s21  ;;  %p128_p4 = scmp.eq.s32.totalorder %s1723_s26, 1 }
   0xc   : > { %s1387_s30 = scalar_select %p109_p1, %s1302_s23, %s111_s28  }
   0xd   : > { %p1389_p5 = por %p122_p2, %p121_p0  ;;  %p1393_p6 = por %p128_p4, %p127_p3 }
   0xe   : > { %p1032_p7 = scmp.ge.s32.totalorder %s1306_s24, 1  ;;  %p238_p8 = scmp.lt.s32.totalorder %s1306_s24, 3 }
  0x10   : > { %p239_p9 = pnand %p1032_p7, %p238_p8 }
  0x11   : > { %p289_p10 = scmp.lt.s32.totalorder (!%p239_p9), %s1370_s25, 1  ;;  %s1569_s18 = sand.u32 (!%p239_p9), 1, %s1298_s22  }
  0x12   : > { %242 = sbr.rel (%p239_p9) target bundleno = 538 (0x21a), region = 28  ;;  %s752_s19 = scvt.s32.f32 (!%p239_p9), %s1370_s25 }
  0x13   : > { %s796_s29 = scalar_lea.hbm (!%p239_p9), %s1719_s3, %s1370_s25  ;;  %s267_s11 = scalar_lea.vmem (!%p239_p9), [#allocation2], %s1569_s18 }
  0x14   : > { %s1578_s12 = sshll.u32 (!%p239_p9), %s267_s11, 4  ;;  %s770_s28 = scalar_lea.sflag (!%p239_p9), [#allocation3], %s1569_s18  ;;  %s799_s12 = int_to_ptr.vmem [resolvable:$true] %s1578_s12 }
  0x15   : > { %s1172_s26 = scalar_lea.hbm (!%p239_p9), %s1719_s3, 2 }
  0x17   : > { %v1308_v0 = vmov 2   ;;  %v1309_v1 = vmov 0   ;;  %s1401_s9 = scalar_select %p289_p10, %s1370_s25, 1  ;;  %v1310_v6 = vmov 3   ;;  %v1311_v7 = vmov 1  }
  0x18   : > { %1123 = vset.pattern.permute.xlu1 %v1308_v0  ;;  %1121 = vset.pattern.permute.xlu0 %v1309_v1  ;;  %v524_v40 = vlaneseq  ;;  %v1312_v61 = vmov 1.0  }
  0x19   : > { %1125 = vset.pattern.permute.xlu2 %v1309_v1  ;;  %s1037_s10 = sshll.u32 %s1401_s9, 2  ;;  %s1036_s14 = sshll.u32 %s1401_s9, 1 }
  0x1a   : > { %s296_s13 = scalar_lea.vmem %s1717_s1, %s1037_s10  ;;  %s292_s17 = scalar_lea.vmem %s1716_s0, %s1036_s14  ;;  %v1453_v43 = vshrl.u32 %v524_v40, 7  ;;  %v1459_v48 = vand.u32 127, %v524_v40 }
  0x1b   : > { %v302_v2 = vld [vmem:[%s296_s13] sm:$0x7]  ;;  %s1580_s13 = sshll.u32 %s796_s29, 4  ;;  %s300_s16 = scalar_lea.vmem %s1718_s2, %s1037_s10  ;;  %s801_s13 = int_to_ptr.hbm [resolvable:$true] %s1580_s13 }
  0x1c   : > { %414 = vperm.xlu1 %1123, %v302_v2   ;;  %314 = vperm.xlu0 %1121, %v302_v2   ;;  %v309_v3 = vrot.slane %v302_v2, 7  ;;  %v1413_v9 = vld [vmem:[%s292_s17] sm:$0x3]  ;;  %v527_v52 = vadd.s32 16, %v1453_v43  ;;  %v526_v55 = vadd.s32 8, %v1453_v43  ;;  %vm530_vm5 = vcmp.le.s32.totalorder %v1453_v43, %v1459_v48  ;;  %s1592_s17 = sshll.u32 %s1370_s25, 1 }
  0x1d   : > { %v304_v11 = vrot.slane %v1413_v9, 7  ;;  %s1600_s9 = sshll.u32 %s1569_s18, 1  ;;  %s838_s20 = scalar_lea.hbm %s1722_s6, %s1592_s17 }
  0x1e   : > { %v311_v4 = vsub.f32 %v302_v2, %v309_v3  ;;  %vm532_vm1 = vcmp.le.s32.totalorder %v527_v52, %v1459_v48  ;;  %vm531_vm2 = vcmp.le.s32.totalorder %v526_v55, %v1459_v48  ;;  %s1166_s29 = sshra.s32 %s801_s13, 4  ;;  %s1167_s29 = int_to_ptr.hbm [resolvable:$true] %s1166_s29 }
  0x1f   : > { %v306_v14 = vsub.f32 %v1413_v9, %v304_v11  ;;  %1044 = vmatpush.msk.msra.mxu0 %vm532_vm1, %v1312_v61  ;;  %s1168_s14 = scalar_lea.hbm %s1167_s29, 1  ;;  %p1173_p0 = scmp.lt.s32.totalorder %s1167_s29, %s1719_s3 }
  0x20   : > { %v312_v5 = vadd.f32 1.0, %v311_v4  ;;  %p1169_p11 = scmp.ne.s32.totalorder %s1167_s29, %s1168_s14  ;;  %p1174_p1 = scmp.lt.s32.totalorder %s1172_s26, %s1168_s14 }
  0x21   : > { %v1427_v20 = vadd.f32 1.0, %v306_v14  ;;  %1045 = vmatpush.msk.msra.mxu0 %vm531_vm2, %v1312_v61 }
  0x22   : > { %327 = vperm.xlu2 %1125, %v312_v5   ;;  %vm347_vm0 = vcmp.eq.f32.partialorder %v312_v5, 1.0  ;;  %p1170_p12 = pnand %p1169_p11, %p1389_p5  ;;  %p1175_p2 = por %p1174_p1, %p1173_p0 }
  0x23   : > { %v348_v8 = vsel %vm347_vm0, 1, %v1309_v1  ;;  %1046 = vmatpush.msk.msra.mxu0 %vm530_vm5, %v1312_v61  ;;  %vm354_vm9 = vcmp.eq.f32.partialorder %v1427_v20, 1.0 }
  0x24   : > { %1124 = vset.pattern.permute.xlu1 %v1310_v6  ;;  %1122 = vset.pattern.permute.xlu0 %v1311_v7  ;;  %p1171_p13 = pneg %p1170_p12 }
  0x25   : > { %462 = vperm.xlu1 %1124, %v302_v2   ;;  %366 = vperm.xlu0 %1122, %v302_v2  }
  0x26   : > { %p1176_p3 = pnand %p1175_p2, %p1171_p13 }
  0x2a   : > { %1126 = vset.pattern.permute.xlu2 %v1311_v7 }
  0x2b   : > { %378 = vperm.xlu2 %1126, %v312_v5  }
  0x2d   : > { %1127 = vset.pattern.permute.xlu1 %v1308_v0  ;;  %1129 = vset.pattern.permute.xlu0 %v1309_v1 }
  0x2e   : > { %426 = vperm.xlu1 %1127, %v312_v5   ;;  %350 = vperm.xlu0 %1129, %v348_v8  }
  0x33   : > { %1128 = vset.pattern.permute.xlu2 %v1310_v6 }
  0x34   : > { %474 = vperm.xlu2 %1128, %v312_v5  }
  0x36   : > { %1130 = vset.pattern.permute.xlu1 %v1311_v7  ;;  %1133 = vset.pattern.permute.xlu0 %v1310_v6 }
  0x37   : > { %399 = vperm.xlu1 %1130, %v348_v8  }
  0x3c   : > { %1131 = vset.pattern.permute.xlu2 %v1308_v0 }
  0x3d   : > { %447 = vperm.xlu2 %1131, %v348_v8  }
  0x3f   : > { %1132 = vset.pattern.permute.xlu1 %v1310_v6 }
  0x40   : > { %495 = vperm.xlu1 %1132, %v348_v8  }
  0x7c   : > { %v328_v10 = vpop.permute.xlu2 %327 }
  0x7d   : > { %v330_v28 = vadd.f32 %v328_v10, %v1427_v20 }
  0x85   : > { %v379_v19 = vpop.permute.xlu2 %378 }
  0x86   : > { %v381_v44 = vadd.f32 %v379_v19, %v1427_v20 }
  0x8e   : > { %v1416_v12 = vpop.permute.xlu1 %414  ;;  %v1418_v13 = vpop.permute.xlu0 %314 }
  0x8f   : > { %v318_v15 = vmax.f32 %v1413_v9, %v1418_v13  ;;  %v418_v16 = vmax.f32 %v1413_v9, %v1416_v12  ;;  %v317_v17 = vmin.f32 %v1413_v9, %v1418_v13  ;;  %v417_v22 = vmin.f32 %v1413_v9, %v1416_v12  ;;  %v475_v38 = vpop.permute.xlu2 %474 }
  0x90   : > { %v477_v46 = vadd.f32 %v475_v38, %v1427_v20  ;;  %v358_v5 = vrot.slane %v1418_v13, 1  ;;  %v361_v6 = vrot.slane %v1418_v13, 7 }
  0x91   : > { %v320_v18 = vrot.slane %v318_v15, 7  ;;  %v420_v23 = vrot.slane %v418_v16, 7 }
  0x93   : > { %v322_v21 = vsub.f32 %v317_v17, %v320_v18  ;;  %v422_v30 = vsub.f32 %v417_v22, %v420_v23 }
  0x95   : > { %v1431_v24 = vadd.f32 1.0, %v322_v21  ;;  %v1449_v39 = vadd.f32 1.0, %v422_v30 }
  0x97   : > { %v1433_v25 = vpop.permute.xlu1 %462  ;;  %v1435_v26 = vpop.permute.xlu0 %366  ;;  %v324_v27 = vmax.f32 %v1431_v24, 0.0  ;;  %v424_v50 = vmax.f32 %v1449_v39, 0.0  ;;  %v454_v39 = vrot.slane %v1416_v12, 1 }
  0x98   : > { %v370_v29 = vmax.f32 %v1413_v9, %v1435_v26  ;;  %v465_v32 = vmin.f32 %v1413_v9, %v1433_v25  ;;  %v466_v33 = vmax.f32 %v1413_v9, %v1433_v25  ;;  %v369_v34 = vmin.f32 %v1413_v9, %v1435_v26 }
  0x99   : > { %v331_v31 = vsub.f32 %v330_v28, %v324_v27 }
  0x9a   : > { %v372_v35 = vrot.slane %v370_v29, 7  ;;  %v468_v36 = vrot.slane %v466_v33, 7 }
  0x9b   : > { %1134 = vrcp.f32 %v331_v31  ;;  %v343_v62 = vand.u32 2147483648, %v331_v31  ;;  %v341_v0 = vand.u32 2147483647, %v331_v31  ;;  %vm337_vm4 = vweird.f32 %v331_v31 }
  0x9c   : > { %v374_v37 = vsub.f32 %v369_v34, %v372_v35  ;;  %v470_v41 = vsub.f32 %v465_v32, %v468_v36 }
  0x9d   : > { %v344_v3 = vor.u32 1.1754944e-38, %v343_v62  ;;  %vm342_vm7 = vcmp.eq.f32.partialorder %v341_v0, 8.507059e+37 }
  0x9e   : > { %v1451_v42 = vadd.f32 1.0, %v374_v37  ;;  %v1456_v45 = vadd.f32 1.0, %v470_v41 }
  0xa0   : > { %v427_v47 = vpop.permute.xlu1 %426  ;;  %v376_v49 = vmax.f32 %v1451_v42, 0.0  ;;  %v472_v54 = vmax.f32 %v1456_v45, 0.0  ;;  %v351_v1 = vpop.permute.xlu0 %350 }
  0xa1   : > { %v429_v51 = vadd.f32 %v427_v47, %v1427_v20  ;;  %v1135_v53 = vpop.eup %1134  ;;  %vm352_vm8 = vcmp.eq.s32.totalorder %v351_v1, 1  ;;  %v406_v1 = vrot.slane %v1435_v26, 1  ;;  %v1313_v20 = vmov 0.0  }
  0xa2   : > { %v333_v56 = vmul.f32 %v1135_v53, %v331_v31  ;;  %v1469_v57 = vsub.f32 %v381_v44, %v376_v49  ;;  %v1477_v59 = vsub.f32 %v477_v46, %v472_v54  ;;  %vm338_vm3 = vweird.f32 %v1135_v53 }
  0xa3   : > { %v1473_v58 = vsub.f32 %v429_v51, %v424_v50  ;;  %vm339_vm6 = vmor %vm337_vm4, %vm338_vm3 }
  0xa4   : > { %1136 = vrcp.f32 %v1469_v57  ;;  %v334_v60 = vsub.f32 1.0, %v333_v56  ;;  %vm388_vm10 = vweird.f32 %v1469_v57  ;;  %v392_v17 = vand.u32 2147483647, %v1469_v57 }
  0xa5   : > { %1138 = vrcp.f32 %v1477_v59  ;;  %v394_v22 = vand.u32 2147483648, %v1469_v57  ;;  %vm484_vm11 = vweird.f32 %v1477_v59  ;;  %v488_v29 = vand.u32 2147483647, %v1477_v59 }
  0xa6   : > { %1140 = vrcp.f32 %v1473_v58  ;;  %v335_v63 = vmul.f32 %v1135_v53, %v334_v60  ;;  %v490_v24 = vand.u32 2147483648, %v1477_v59  ;;  %v440_v33 = vand.u32 2147483647, %v1473_v58 }
  0xa7   : > { %v442_v37 = vand.u32 2147483648, %v1473_v58  ;;  %vm393_vm1 = vcmp.eq.f32.partialorder %v392_v17, 8.507059e+37  ;;  %v395_v46 = vor.u32 1.1754944e-38, %v394_v22  ;;  %vm489_vm3 = vcmp.eq.f32.partialorder %v488_v29, 8.507059e+37 }
  0xa8   : > { %v336_v2 = vadd.f32 %v1135_v53, %v335_v63  ;;  %v491_v47 = vor.u32 1.1754944e-38, %v490_v24  ;;  %vm436_vm4 = vweird.f32 %v1473_v58 }
  0xa9   : > { %v400_v8 = vpop.permute.xlu1 %399  ;;  %v443_v60 = vor.u32 1.1754944e-38, %v442_v37 }
  0xaa   : > { %v1137_v4 = vpop.eup %1136  ;;  %v340_v7 = vsel %vm339_vm6, %v1135_v53, %v336_v2  ;;  %v448_v53 = vpop.permute.xlu2 %447  ;;  %vm441_vm6 = vcmp.eq.f32.partialorder %v440_v33, 8.507059e+37  ;;  %v409_v2 = vrot.slane %v1435_v26, 7 }
  0xab   : > { %v1139_v10 = vpop.eup %1138  ;;  %v384_v11 = vmul.f32 %v1137_v4, %v1469_v57  ;;  %v345_v14 = vsel %vm342_vm7, %v344_v3, %v340_v7  ;;  %vm389_vm12 = vweird.f32 %v1137_v4  ;;  %vm401_vm7 = vcmp.eq.s32.totalorder %v400_v8, 1 }
  0xac   : > { %v1141_v15 = vpop.eup %1140  ;;  %v346_v16 = vmul.f32 %v345_v14, %v324_v27  ;;  %v480_v18 = vmul.f32 %v1139_v10, %v1477_v59  ;;  %vm485_vm14 = vweird.f32 %v1139_v10  ;;  %vm1510_vm15 = vmor %vm388_vm10, %vm389_vm12  ;;  %vm449_vm10 = vcmp.eq.s32.totalorder %v448_v53, 1 }
  0xad   : > { %v432_v19 = vmul.f32 %v1141_v15, %v1473_v58  ;;  %v385_v21 = vsub.f32 1.0, %v384_v11  ;;  %vm437_vm0 = vweird.f32 %v1141_v15  ;;  %vm486_vm2 = vmor %vm484_vm11, %vm485_vm14  ;;  %v502_v7 = vrot.slane %v1433_v25, 1 }
  0xae   : > { %v353_v23 = vsel %vm352_vm8, 0.0, %v346_v16  ;;  %v481_v28 = vsub.f32 1.0, %v480_v18  ;;  %vm438_vm5 = vmor %vm436_vm4, %vm437_vm0  ;;  %vm517_vm14 = vcmask 189441   ;;  %vm639_vm0 = vcmask 1041408  }
  0xaf   : > { %v355_v27 = vsel %vm354_vm9, -1.0, %v353_v23  ;;  %v386_v30 = vmul.f32 %v1137_v4, %v385_v21  ;;  %v433_v31 = vsub.f32 1.0, %v432_v19  ;;  %vm544_vm4 = vcmask 195584  }
  0xb0   : > { %vm356_vm13 = vcmp.gt.f32.partialorder %v355_v27, -1e+30  ;;  %v482_v32 = vmul.f32 %v1139_v10, %v481_v28 }
  0xb1   : > { %v360_v34 = vsel %vm356_vm13, %v358_v5, 0.0  ;;  %v363_v35 = vsel %vm356_vm13, %v361_v6, 0.0  ;;  %v364_v36 = vsel %vm356_vm13, %v1418_v13, 0.0  ;;  %v387_v38 = vadd.f32 %v1137_v4, %v386_v30 }
  0xb2   : > { %v483_v41 = vadd.f32 %v1139_v10, %v482_v32  ;;  %v434_v44 = vmul.f32 %v1141_v15, %v433_v31  ;;  %v496_v51 = vpop.permute.xlu1 %495  ;;  %v357_v42 = vsel %vm356_vm13, %v355_v27, -1e+30 }
  0xb3   : > { %v391_v13 = vsel %vm1510_vm15, %v1137_v4, %v387_v38  ;;  %vm497_vm8 = vcmp.eq.s32.totalorder %v496_v51, 1  ;;  %vm542_vm15 = vcmask 1040384   ;;  %v574_v51 = vcvt.s32.f32 %v1453_v43 }
  0xb4   : > { %v487_v52 = vsel %vm486_vm2, %v1139_v10, %v483_v41  ;;  %v435_v55 = vadd.f32 %v1141_v15, %v434_v44  ;;  %v396_v56 = vsel %vm393_vm1, %v395_v46, %v391_v13  ;;  %v505_v10 = vrot.slane %v1433_v25, 7 }
  0xb5   : > { %v492_v57 = vsel %vm489_vm3, %v491_v47, %v487_v52  ;;  %v397_v61 = vmul.f32 %v396_v56, %v376_v49 }
  0xb6   : > { %v493_v59 = vmul.f32 %v492_v57, %v472_v54  ;;  %v439_v62 = vsel %vm438_vm5, %v1141_v15, %v435_v55  ;;  %vm641_vm5 = vcmask 1042432  }
  0xb7   : > { %v444_v63 = vsel %vm441_vm6, %v443_v60, %v439_v62  ;;  %v402_v0 = vsel %vm401_vm7, 0.0, %v397_v61  ;;  %vm643_vm6 = vcmask 1043456  }
  0xb8   : > { %v445_v58 = vmul.f32 %v444_v63, %v424_v50  ;;  %v403_v45 = vsel %vm354_vm9, -1.0, %v402_v0  ;;  %v498_v49 = vsel %vm497_vm8, 0.0, %v493_v59  ;;  %v457_v50 = vrot.slane %v1416_v12, 7 }
  0xb9   : > { %vm404_vm11 = vcmp.gt.f32.partialorder %v403_v45, %v357_v42  ;;  %v499_v11 = vsel %vm354_vm9, -1.0, %v498_v49 }
  0xba   : > { %v450_v54 = vsel %vm449_vm10, 0.0, %v445_v58  ;;  %v408_v3 = vsel %vm404_vm11, %v406_v1, %v360_v34  ;;  %v411_v4 = vsel %vm404_vm11, %v409_v2, %v363_v35  ;;  %v412_v5 = vsel %vm404_vm11, %v1435_v26, %v364_v36 }
  0xbb   : > { %v405_v6 = vsel %vm404_vm11, %v403_v45, %v357_v42  ;;  %v451_v8 = vsel %vm354_vm9, -1.0, %v450_v54 }
  0xbc   : > { %vm452_vm12 = vcmp.gt.f32.partialorder %v451_v8, %v405_v6 }
  0xbd   : > { %v453_v14 = vsel %vm452_vm12, %v451_v8, %v405_v6  ;;  %v456_v15 = vsel %vm452_vm12, %v454_v39, %v408_v3  ;;  %v459_v16 = vsel %vm452_vm12, %v457_v50, %v411_v4  ;;  %v460_v26 = vsel %vm452_vm12, %v1416_v12, %v412_v5 }
  0xbe   : > { %vm500_vm13 = vcmp.gt.f32.partialorder %v499_v11, %v453_v14 }
  0xbf   : > { %v504_v17 = vsel %vm500_vm13, %v502_v7, %v456_v15  ;;  %v501_v18 = vsel %vm500_vm13, %v499_v11, %v453_v14  ;;  %v507_v19 = vsel %vm500_vm13, %v505_v10, %v459_v16  ;;  %v508_v21 = vsel %vm500_vm13, %v1433_v25, %v460_v26 }
  0xc0   : > { %v631_v22 = vrot.slane %v504_v17, 7  ;;  %vm509_vm1 = vcmp.ge.f32.partialorder %v501_v18, 0.5  ;;  %vm512_vm2 = vcmp.lt.f32.partialorder %v501_v18, 0.5  ;;  %vm513_vm3 = vcmp.ge.f32.partialorder %v501_v18, 0.0 }
  0xc1   : > { %v1542_v23 = vsel %vm509_vm1, 1.0, %v1313_v20  ;;  %vm514_vm9 = vmand %vm512_vm2, %vm513_vm3  ;;  %v634_v12 = vrot.slane %v507_v19, 6  ;;  %v637_v27 = vrot.slane %v508_v21, 5 }
  0xc2   : > { %v518_v28 = vsel %vm517_vm14, %v1542_v23, 0.0  ;;  %v540_v29 = vrot.slane %v1542_v23, 1  ;;  %v1548_v24 = vsel %vm514_vm9, 1.0, %v1313_v20  ;;  %v640_v30 = vsel %vm639_vm0, %v1413_v9, %v631_v22 }
  0xc3   : > { %519 = vadd.xlane.f32.xlu2 %v518_v28  ;;  %v521_v25 = vsel %vm517_vm14, %v1548_v24, 0.0  ;;  %v642_v32 = vsel %vm641_vm5, %v640_v30, %v634_v12  ;;  %v621_v26 = vperm.slane %v1542_v23, 1  ;;  %v625_v17 = vperm.slane %v1548_v24, 1 }
  0xc4   : > { %522 = vadd.xlane.f32.xlu0 %v521_v25  ;;  %v543_v31 = vsel %vm542_vm15, %v540_v29, %v1548_v24  ;;  %v1557_v33 = vsel %vm643_vm6, %v642_v32, %v637_v27  ;;  %v671_v22 = vcvt.s32.f32 %v1459_v48  ;;  %v753_v12 = vstv %s752_s19 }
  0xc5   : > { %1047 = vmatmul.msk.f32.vlgmr.msra.gmra.mxu0 %vm544_vm4, %v543_v31 }
 0x136   : > { %v520_v34 = vpop.xlane.xlu2 %519 }
 0x137   : > { %v575_v35 = vmax.f32 %v520_v34, 1.0  ;;  %v523_v36 = vpop.xlane.xlu0 %522  ;;  %v571_v38 = vmin.f32 %v520_v34, 2.0  ;;  %vm569_vm8 = vcmp.gt.f32.partialorder %v520_v34, 0.0 }
 0x138   : > { %v576_v37 = vmax.f32 %v523_v36, 1.0  ;;  %vm570_vm7 = vcmp.gt.f32.partialorder %v523_v36, 0.0 }
 0x139   : > { %v577_v40 = vperm.slane %v575_v35, 1  ;;  %v572_v9 = vsel %vm570_vm7, %v571_v38, 8.0 }
 0x13a   : > { %v599_v41 = vperm.slane %v576_v37, 1  ;;  %v1559_v44 = vsel %vm569_vm8, %v572_v9, 0.0  ;;  %vm757_vm8 = vcmask 59392  }
 0x13b   : > { %1142 = vrcp.f32 %v577_v40  ;;  %v596_v52 = vperm.slane %v1559_v44, 1  ;;  %v589_v57 = vand.u32 2147483648, %v577_v40  ;;  %v587_v59 = vand.u32 2147483647, %v577_v40 }
 0x13c   : > { %1144 = vrcp.f32 %v599_v41  ;;  %v611_v60 = vand.u32 2147483648, %v599_v41  ;;  %v609_v0 = vand.u32 2147483647, %v599_v41  ;;  %vm583_vm12 = vweird.f32 %v577_v40 }
 0x13d   : > { %v597_v62 = vsub.f32 %v574_v51, %v596_v52  ;;  %vm605_vm13 = vweird.f32 %v599_v41  ;;  %v590_v43 = vor.u32 1.1754944e-38, %v589_v57  ;;  %vm588_vm2 = vcmp.eq.f32.partialorder %v587_v59, 8.507059e+37 }
 0x13e   : > { %v612_v2 = vor.u32 1.1754944e-38, %v611_v60  ;;  %vm610_vm3 = vcmp.eq.f32.partialorder %v609_v0, 8.507059e+37  ;;  %vm618_vm6 = vcmp.lt.f32.partialorder %v574_v51, %v596_v52  ;;  %vm672_vm7 = vcmp.lt.f32.partialorder %v671_v22, %v1559_v44 }
 0x13f   : > { %v598_v45 = vmax.f32 %v597_v62, 0.0 }
 0x141   : > { %v1143_v46 = vpop.eup %1142 }
 0x142   : > { %v1145_v47 = vpop.eup %1144  ;;  %v579_v13 = vmul.f32 %v1143_v46, %v577_v40  ;;  %vm584_vm10 = vweird.f32 %v1143_v46  ;;  %v565_v54 = vpop.f32.mrf.mxu0 }
 0x143   : > { %v601_v53 = vmul.f32 %v1145_v47, %v599_v41  ;;  %vm606_vm11 = vweird.f32 %v1145_v47  ;;  %vm585_vm14 = vmor %vm583_vm12, %vm584_vm10  ;;  %v1048_v39 = vadd.f32 -1.0, %v565_v54 }
 0x144   : > { %v580_v55 = vsub.f32 1.0, %v579_v13  ;;  %vm607_vm1 = vmor %vm605_vm13, %vm606_vm11 }
 0x145   : > { %v602_v56 = vsub.f32 1.0, %v601_v53  ;;  %v619_v11 = vperm.slane %v1048_v39, 0  ;;  %v623_v15 = vperm.slane %v1048_v39, 1 }
 0x146   : > { %v581_v61 = vmul.f32 %v1143_v46, %v580_v55 }
 0x147   : > { %v603_v63 = vmul.f32 %v1145_v47, %v602_v56 }
 0x148   : > { %v582_v58 = vadd.f32 %v1143_v46, %v581_v61 }
 0x149   : > { %v604_v1 = vadd.f32 %v1145_v47, %v603_v63 }
 0x14a   : > { %v586_v42 = vsel %vm585_vm14, %v1143_v46, %v582_v58 }
 0x14b   : > { %v608_v49 = vsel %vm607_vm1, %v1145_v47, %v604_v1  ;;  %v591_v3 = vsel %vm588_vm2, %v590_v43, %v586_v42 }
 0x14c   : > { %v613_v4 = vsel %vm610_vm3, %v612_v2, %v608_v49  ;;  %v592_v5 = vmul.f32 %v591_v3, %v574_v51 }
 0x14d   : > { %v614_v6 = vmul.f32 %v613_v4, %v598_v45 }
 0x14e   : > { %v593_v50 = vfloor.f32 %v592_v5 }
 0x14f   : > { %v615_v7 = vfloor.f32 %v614_v6 }
 0x150   : > { %v594_v8 = vmul.f32 %v593_v50, %v577_v40 }
 0x151   : > { %v616_v10 = vmul.f32 %v615_v7, %v599_v41 }
 0x152   : > { %v595_v14 = vsub.f32 %v574_v51, %v594_v8 }
 0x153   : > { %v617_v16 = vsub.f32 %v598_v45, %v616_v10 }
 0x154   : > { %vm620_vm9 = vcmp.eq.f32.partialorder %v619_v11, %v595_v14 }
 0x155   : > { %v622_v18 = vsel %vm620_vm9, %v621_v26, 0.0  ;;  %vm624_vm5 = vcmp.eq.f32.partialorder %v623_v15, %v617_v16 }
 0x156   : > { %v626_v19 = vsel %vm624_vm5, %v625_v17, 0.0 }
 0x157   : > { %v629_v21 = vsel %vm618_vm6, %v622_v18, %v626_v19 }
 0x158   : > { %1049 = vmatpush.xpose.msk.msra.mxu1 %vm544_vm4, %v629_v21 }
 0x15b   : > { %1050 = vmatmul.msk.f32.vlgmr.msra.gmra.mxu1 %vm544_vm4, %v1557_v33  ;;  %vm759_vm4 = vcmask 58369  }
 0x1d8   : > { %v1587_v23 = vpop.f32.mrf.mxu1 }
 0x1d9   : > { %v674_v28 = vrot.slane %v1587_v23, 1  ;;  %v677_v48 = vrot.slane %v1587_v23, 7 }
 0x1db   : > { %v676_v29 = vsel %vm672_vm7, %v674_v28, 0.0  ;;  %v679_v24 = vsub.f32 %v1587_v23, %v677_v48  ;;  %v755_v25 = vsel %vm542_vm15, %v753_v12, %v677_v48 }
 0x1dc   : > { %vm729_vm10 = vcmp.gt.f32.partialorder %v676_v29, 0.0  ;;  %v756_v27 = vsel %vm639_vm0, %v755_v25, %v677_v48  ;;  %760 = vst.msk [vmem:[%s267_s11 - $0x1] sm:$0x2] %vm759_vm4, %v676_v29 }
 0x1dd   : > { %v1607_v30 = vadd.f32 1.0, %v679_v24  ;;  %v1610_v31 = vsel %vm729_vm10, 1.0, %v1313_v20  ;;  %758 = vst.msk [vmem:[%s300_s16] sm:$0x7] %vm757_vm8, %v756_v27 }
 0x1de   : > { %1179 = shalt.err (!%p1176_p3)
}
 0x1df   : > { %1061 = dma.vmem_to_hbm [thread:$0]  (%p1389_p5), %s799_s12, 16, %s801_s13, %s770_s28   ;;  %v746_v32 = vrot.slane %v1610_v31, 1  ;;  %vm761_vm0 = vcmask 58368   ;;  %v691_v33 = vrot.slane %v1607_v30, 6  ;;  %v708_v34 = vrot.slane %v1607_v30, 5 }
 0x1e0   : > { %s288_s26 = scalar_lea.vmem [#allocation7], %s1600_s9  ;;  %s842_s29 = sshll.u32 %s838_s20, 4  ;;  %v681_v36 = vmul.f32 0.5, %v1607_v30  ;;  %s843_s29 = int_to_ptr.hbm [resolvable:$true] %s842_s29 }
 0x1e1   : > { %v748_v35 = vsel %vm542_vm15, %v746_v32, %v1610_v31  ;;  %s840_s16 = sshll.u32 %s288_s26, 4  ;;  %1146 = vrcp.f32 %v691_v33  ;;  %s281_s14 = scalar_lea.vmem [#allocation6], %s1600_s9  ;;  %s841_s16 = int_to_ptr.vmem [resolvable:$true] %s840_s16 }
 0x1e2   : > { %763 = vst.msk [vmem:[%s281_s14] sm:$0x3] %vm761_vm0, %v748_v35  ;;  %1148 = vrcp.f32 %v708_v34  ;;  %vm749_vm11 = vcmp.gt.f32.partialorder %v748_v35, 0.0  ;;  %s784_s12 = scalar_lea.sflag [#allocation8], %s1569_s18  ;;  %s1194_s13 = sshra.s32 %s843_s29, 4  ;;  %s1195_s13 = int_to_ptr.hbm [resolvable:$true] %s1194_s13 }
 0x1e3   : > { %v1052_v37 = vsel %vm749_vm11, 1.0, %v1313_v20  ;;  %s1196_s20 = scalar_lea.hbm %s1195_s13, 2  ;;  %s1200_s11 = scalar_lea.hbm %s1722_s6, 4 }
 0x1e4   : > { %764 = vst.msk [vmem:[%s288_s26] sm:$0x3] %vm761_vm0, %v1052_v37  ;;  %p1197_p4 = scmp.ne.s32.totalorder %s1195_s13, %s1196_s20  ;;  %p1201_p9 = scmp.lt.s32.totalorder %s1195_s13, %s1722_s6 }
 0x1e5   : > { %p1202_p10 = scmp.lt.s32.totalorder %s1200_s11, %s1196_s20 }
 0x1e6   : > { %p1198_p7 = pnand %p1197_p4, %p1389_p5 }
 0x1e7   : > { %p1203_p11 = por %p1202_p10, %p1201_p9 }
 0x1e8   : > { %p1199_p8 = pneg %p1198_p7 }
 0x1ea   : > { %p1204_p12 = pnand %p1203_p11, %p1199_p8 }
 0x1ec   : > { %1207 = shalt.err (!%p1204_p12)
}
 0x1ed   : > { %1064 = dma.vmem_to_hbm [thread:$0]  (%p1389_p5), %s841_s16, 32, %s843_s29, %s784_s12   ;;  %v1147_v20 = vpop.eup %1146  ;;  %v683_v40 = vrot.slane %v681_v36, 1  ;;  %v721_v51 = vand.u32 2147483648, %v708_v34  ;;  %v704_v52 = vand.u32 2147483648, %v691_v33  ;;  %v719_v55 = vand.u32 2147483647, %v708_v34 }
 0x1ee   : > { %v1149_v38 = vpop.eup %1148  ;;  %v694_v41 = vmul.f32 %v1147_v20, %v691_v33  ;;  %vm699_vm12 = vweird.f32 %v1147_v20  ;;  %vm698_vm14 = vweird.f32 %v691_v33  ;;  %v702_v57 = vand.u32 2147483647, %v691_v33  ;;  %s810_s16 = scalar_lea.hbm %s1720_s4, %s1592_s17  ;;  %s824_s13 = scalar_lea.hbm %s1721_s5, %s1592_s17 }
 0x1ef   : > { %v711_v9 = vmul.f32 %v1149_v38, %v708_v34  ;;  %v685_v47 = vadd.f32 %v683_v40, %v1587_v23  ;;  %vm716_vm13 = vweird.f32 %v1149_v38  ;;  %vm700_vm1 = vmor %vm698_vm14, %vm699_vm12  ;;  %vm715_vm2 = vweird.f32 %v708_v34  ;;  %s773_s20 = sand.u32 1, %s1370_s25   ;;  %s274_s28 = scalar_lea.vmem [#allocation4], %s1600_s9 }
 0x1f0   : > { %v695_v44 = vsub.f32 1.0, %v694_v41  ;;  %vm717_vm3 = vmor %vm715_vm2, %vm716_vm13  ;;  %v722_v62 = vor.u32 1.1754944e-38, %v721_v51  ;;  %v705_v63 = vor.u32 1.1754944e-38, %v704_v52  ;;  %vm720_vm9 = vcmp.eq.f32.partialorder %v719_v55, 8.507059e+37  ;;  %s812_s15 = sshll.u32 %s274_s28, 4  ;;  %s814_s11 = sshll.u32 %s810_s16, 4  ;;  %s813_s15 = int_to_ptr.vmem [resolvable:$true] %s812_s15  ;;  %s815_s11 = int_to_ptr.hbm [resolvable:$true] %s814_s11 }
 0x1f1   : > { %v712_v46 = vsub.f32 1.0, %v711_v9  ;;  %v687_v61 = vrot.slane %v685_v47, 5  ;;  %vm703_vm5 = vcmp.eq.f32.partialorder %v702_v57, 8.507059e+37  ;;  %v733_v54 = vrot.slane %v1610_v31, 6  ;;  %s1663_s10 = sshll.u32 %s281_s14, 4  ;;  %s1665_s19 = sshll.u32 %s824_s13, 4  ;;  %s827_s10 = int_to_ptr.vmem [resolvable:$true] %s1663_s10  ;;  %s829_s19 = int_to_ptr.hbm [resolvable:$true] %s1665_s19 }
 0x1f2   : > { %v696_v13 = vmul.f32 %v1147_v20, %v695_v44  ;;  %v736_v5 = vrot.slane %v1610_v31, 5  ;;  %s774_s25 = scalar_lea.sflag [#allocation5], %s773_s20  ;;  %s1222_s17 = sshra.s32 %s815_s11, 4  ;;  %s1223_s17 = int_to_ptr.hbm [resolvable:$true] %s1222_s17 }
 0x1f3   : > { %v713_v53 = vmul.f32 %v1149_v38, %v712_v46  ;;  %v689_v2 = vsub.f32 %v685_v47, %v687_v61  ;;  %s1224_s9 = scalar_lea.hbm %s1223_s17, 2  ;;  %s1228_s26 = scalar_lea.hbm %s1720_s4, 4 }
 0x1f4   : > { %v697_v56 = vadd.f32 %v1147_v20, %v696_v13  ;;  %p1225_p13 = scmp.ne.s32.totalorder %s1223_s17, %s1224_s9  ;;  %p1229_p2 = scmp.lt.s32.totalorder %s1223_s17, %s1720_s4 }
 0x1f5   : > { %v714_v60 = vadd.f32 %v1149_v38, %v713_v53  ;;  %p1230_p3 = scmp.lt.s32.totalorder %s1228_s26, %s1224_s9 }
 0x1f6   : > { %v701_v59 = vsel %vm700_vm1, %v1147_v20, %v697_v56  ;;  %p1226_p0 = pnand %p1225_p13, %p1389_p5 }
 0x1f7   : > { %v718_v0 = vsel %vm717_vm3, %v1149_v38, %v714_v60  ;;  %v706_v1 = vsel %vm703_vm5, %v705_v63, %v701_v59  ;;  %p1231_p4 = por %p1230_p3, %p1229_p2 }
 0x1f8   : > { %v723_v58 = vsel %vm720_vm9, %v722_v62, %v718_v0  ;;  %v707_v42 = vmul.f32 %v706_v1, %v689_v2  ;;  %p1227_p1 = pneg %p1226_p0 }
 0x1f9   : > { %v724_v43 = vmul.f32 %v723_v58, %v1607_v30 }
 0x1fa   : > { %v727_v45 = vmul.f32 10.0, %v707_v42  ;;  %p1232_p7 = pnand %p1231_p4, %p1227_p1 }
 0x1fb   : > { %1150 = vlog2.f32 %v724_v43 }
 0x1fc   : > { %v735_v4 = vmul.f32 %v733_v54, %v727_v45 }
 0x1fe   : > { %v740_v50 = vrot.slane %v735_v4, 3 }
 0x201   : > { %v1151_v49 = vpop.eup %1150 }
 0x202   : > { %v726_v3 = vmul.f32 0.6931472, %v1151_v49 }
 0x204   : > { %v728_v6 = vmul.f32 5.0, %v726_v3 }
 0x206   : > { %v738_v39 = vmul.f32 %v736_v5, %v728_v6 }
 0x208   : > { %v743_v7 = vrot.slane %v738_v39, 3 }
 0x20a   : > { %v745_v8 = vsel %vm542_vm15, %v740_v50, %v743_v7 }
 0x20b   : > { %762 = vst.msk [vmem:[%s274_s28] sm:$0x3] %vm761_vm0, %v745_v8 }
 0x20c   : > { %1235 = shalt.err (!%p1232_p7)
}
 0x20d   : > { %1062 = dma.vmem_to_hbm [thread:$0]  (%p1389_p5), %s813_s15, 32, %s815_s11, %s774_s25  }
 0x20e   : > { %s1250_s12 = sshra.s32 %s829_s19, 4  ;;  %s1256_s17 = scalar_lea.hbm %s1721_s5, 4  ;;  %s1251_s12 = int_to_ptr.hbm [resolvable:$true] %s1250_s12 }
 0x20f   : > { %s1252_s13 = scalar_lea.hbm %s1251_s12, 2  ;;  %p1257_p11 = scmp.lt.s32.totalorder %s1251_s12, %s1721_s5 }
 0x210   : > { %p1253_p8 = scmp.ne.s32.totalorder %s1251_s12, %s1252_s13  ;;  %p1258_p12 = scmp.lt.s32.totalorder %s1256_s17, %s1252_s13 }
 0x212   : > { %p1254_p9 = pnand %p1253_p8, %p1389_p5  ;;  %p1259_p13 = por %p1258_p12, %p1257_p11 }
 0x214   : > { %p1255_p10 = pneg %p1254_p9 }
 0x216   : > { %p1260_p0 = pnand %p1259_p13, %p1255_p10 }
 0x218   : > { %1263 = shalt.err (!%p1260_p0)
}
 0x219   : > { %1063 = dma.vmem_to_hbm [thread:$0]  (%p1389_p5), %s827_s10, 32, %s829_s19, %s774_s25  }
 0x21a PF: > { %p1082_p1 = scmp.ge.s32.totalorder %s1306_s24, 2  ;;  %s861_s15 = sand.u32 1, %s1294_s21  }
 0x21b   : > { %s862_s11 = scalar_lea.sflag [#allocation3], %s861_s15 }
 0x21c   : > { %p1070_p2 = pnand %p1082_p1, %p1393_p6 }
 0x21e   : > { %p1071_p3 = pneg %p1070_p2 }
 0x220   : > { %1281 = dma.done.wait (%p1071_p3), %s862_s11, 16  }
 0x221   : > { %1283 = vsyncadd (%p1071_p3), %s862_s11, 4294967280  ;;  %s1728_s18 = sadd.s32 4294967294, %s1306_s24  }
 0x222   : > { %s870_s7 = sand.u32 1, %s1728_s18  }
 0x223   : > { %s871_s26 = scalar_lea.sflag [#allocation5], %s870_s7 }
 0x224   : > { %1285 = dma.done.wait (%p1071_p3), %s871_s26, 64  }
 0x225   : > { %1287 = vsyncadd (%p1071_p3), %s871_s26, 4294967232  ;;  %s891_s16 = scalar_lea.sflag [#allocation8], %s861_s15 }
 0x226   : > { %1289 = dma.done.wait (%p1071_p3), %s891_s16, 32  }
 0x227   : > { %1291 = vsyncadd (%p1071_p3), %s891_s16, 4294967264  ;;  %p23_p5 = scmp.ge.s32.totalorder %s1374_s27, 4   ;;  %s1729_s21 = smov %s1298_s22 }
 0x228   : > { %s1730_s22 = smov %s1302_s23  ;;  %s1731_s23 = smov %s1387_s30 }
 0x229   : > { %s1732_s24 = smov %s1374_s27  ;;  %25 = sbr.rel (!%p23_p5) target bundleno = 7 (0x7), region = 127 }
 0x22e   :  { %897 = vsyncpa [#allocation3], 1 }
 0x22f   :  { %899 = vsyncpa [#allocation3 + $0x1], 1 }
 0x230   :  { %900 = vsyncpa [#allocation5], 1 }
 0x231   :  { %902 = vsyncpa [#allocation5 + $0x1], 1 }
 0x232   :  { %903 = vsyncpa [#allocation8], 1 }
 0x233   :  { %905 = vsyncpa [#allocation8 + $0x1], 1 }

</bundles_post_ra>
